<compile_context>
chip_gen: v7x
topology: tpu7x:2x2x1
jax: 0.10.0
libtpu: 0.0.40
codegen_flags: <defaults>
</compile_context>

<pallas_src>
import jax
import jax.numpy as jnp
from jax.experimental import pallas as pl
from jax.experimental.pallas import tpu as pltpu


# ----------------------------------------------------------------------------
# Fused kernel: LSTM recurrence + Flatten + Linear(T*H,128) + ReLU + Linear(128,6)
# ----------------------------------------------------------------------------
def lstm_net_kernel(x_ref, wih_ref, whh_ref, b_ref, w1_ref, b1_ref,
                    w2_ref, b2_ref, o_ref):
    # x_ref  : (T*TB, D)   time-major within the batch block (row = t*TB + b)
    # wih_ref: (D, 4H)     input->gate weights (transposed PyTorch weight_ih_l0)
    # whh_ref: (H, 4H)     hidden->gate weights (transposed PyTorch weight_hh_l0)
    # b_ref  : (1, 4H)     combined bias (b_ih + b_hh)
    # w1_ref : (T*H, N1)   first MLP layer (rows in Flatten order t*H + h)
    # b1_ref : (1, N1)
    # w2_ref : (N1, O)
    # b2_ref : (1, O)
    # o_ref  : (TB, O)
    TB = o_ref.shape[0]
    T = x_ref.shape[0] // TB
    H = whh_ref.shape[0]

    # Hoisted input projection: one MXU matmul for all timesteps, bias folded
    # in.  gx is time-major so the per-step slice in the loop is a static
    # contiguous slice and is independent of the recurrence (off the serial
    # h -> h chain; the scheduler can prepare it ahead of each step).
    gx = (jnp.dot(x_ref[...], wih_ref[...], preferred_element_type=jnp.float32)
          + b_ref[...])                                              # (T*TB, 4H)

    whh = whh_ref[...]                                               # reused every step

    h = jnp.zeros((TB, H), jnp.float32)
    c = jnp.zeros((TB, H), jnp.float32)
    hs = []
    # Recurrence, statically unrolled (T is small & static).  The only work on
    # the serial dependency chain per step is ONE MXU matmul + gate math.
    for t in range(T):
        gates = gx[t * TB:(t + 1) * TB, :] + jnp.dot(
            h, whh, preferred_element_type=jnp.float32)              # (TB, 4H)
        # Single full-lane sigmoid over the (TB, 4H) vreg (i, f, o sliced out);
        # the wasted g-quarter is one EUP vreg pass either way.
        sig = jax.nn.sigmoid(gates)
        i_g = sig[:, 0 * H:1 * H]
        f_g = sig[:, 1 * H:2 * H]
        o_g = sig[:, 3 * H:4 * H]
        g_g = jnp.tanh(gates[:, 2 * H:3 * H])
        c = f_g * c + i_g * g_g
        h = o_g * jnp.tanh(c)
        hs.append(h)

    # ---- MLP epilogue (Dropouts are identity at inference).
    # Flatten(B,T,H) @ W1 == concat_t(h_t) @ W1: one matmul, after the loop,
    # instead of a per-step accumulator matmul on the recurrence path.
    flat = jnp.concatenate(hs, axis=1)                               # (TB, T*H)
    hid = jnp.maximum(
        jnp.dot(flat, w1_ref[...], preferred_element_type=jnp.float32)
        + b1_ref[...], 0.0)
    y = (jnp.dot(hid, w2_ref[...], preferred_element_type=jnp.float32)
         + b2_ref[...])
    o_ref[...] = y.astype(o_ref.dtype)


def _num_batch_blocks(B):
    # Split the batch only on chips with 2 TensorCores per chip (v7x); on 1-TC
    # chips (v5e/v6e) the grid is a serial loop, so splitting just re-runs the
    # serial recurrence and adds per-grid-step pipeline overhead.  When we do
    # split, produce exactly 2 blocks (== num TCs) and only when each half is
    # sublane-aligned (B % 16 == 0 -> TB % 8 == 0, required by the (TB, O)
    # output block).  For 8 <= B < 16 one could pad B to 16 in the wrapper to
    # use both TCs; not done here.
    if B % 16 != 0:
        return 1
    try:
        kind = jax.devices()[0].device_kind.lower()
    except Exception:
        return 1
    return 2 if ("v7" in kind or "7x" in kind) else 1


def lstm_net_forward(x_btd, params):
    # x_btd: (B, T, D) batch-first, matching PyTorch's batch_first=True.
    B, T, D = x_btd.shape
    H = params["w_hh_t"].shape[0]
    N1 = params["w1"].shape[1]
    O = params["w2"].shape[1]

    nblk = _num_batch_blocks(B)
    TB = B // nblk

    # Layout plumbing stays in the XLA wrapper (tiny, fused): time-major within
    # each batch block and pre-flattened to 2D, so the kernel never reshapes a
    # lane-sparse (TB, T, D) value.  Row order: g*(T*TB) + t*TB + b_local.
    x_tm = jnp.transpose(x_btd, (1, 0, 2))                           # (T, B, D)
    x_tm = x_tm.reshape(T, nblk, TB, D).transpose(1, 0, 2, 3)
    x_flat = x_tm.reshape(nblk * T * TB, D)                          # (nblk*T*TB, D)

    return pl.pallas_call(
        lstm_net_kernel,
        out_shape=jax.ShapeDtypeStruct((B, O), jnp.float32),
        grid=(nblk,),
        in_specs=[
            pl.BlockSpec((T * TB, D), lambda g: (g, 0)),
            pl.BlockSpec((D, 4 * H), lambda g: (0, 0)),
            pl.BlockSpec((H, 4 * H), lambda g: (0, 0)),
            pl.BlockSpec((1, 4 * H), lambda g: (0, 0)),
            pl.BlockSpec((T * H, N1), lambda g: (0, 0)),
            pl.BlockSpec((1, N1), lambda g: (0, 0)),
            pl.BlockSpec((N1, O), lambda g: (0, 0)),
            pl.BlockSpec((1, O), lambda g: (0, 0)),
        ],
        out_specs=pl.BlockSpec((TB, O), lambda g: (g, 0)),
        compiler_params=pltpu.CompilerParams(
            dimension_semantics=("parallel",),
        ),
    )(x_flat, params["w_ih_t"], params["w_hh_t"], params["b_all"],
      params["w1"], params["b1"], params["w2"], params["b2"])


# ----------------------------------------------------------------------------
# Parameter init (matches PyTorch LSTM / Linear layouts, pre-transposed).
# ----------------------------------------------------------------------------
def init_params(key, input_dim, hidden_dim, time_length):
    ks = jax.random.split(key, 8)
    scale = 1.0 / jnp.sqrt(hidden_dim)
    H4 = 4 * hidden_dim
    # PyTorch LSTM params: weight_ih (4H, D), weight_hh (4H, H), biases (4H,)
    # with i, f, g, o gate ordering.
    w_ih = jax.random.uniform(ks[0], (H4, input_dim), jnp.float32, -scale, scale)
    w_hh = jax.random.uniform(ks[1], (H4, hidden_dim), jnp.float32, -scale, scale)
    b_ih = jax.random.uniform(ks[2], (H4,), jnp.float32, -scale, scale)
    b_hh = jax.random.uniform(ks[3], (H4,), jnp.float32, -scale, scale)
    F = time_length * hidden_dim
    s1 = 1.0 / jnp.sqrt(F)
    w1 = jax.random.uniform(ks[4], (F, 128), jnp.float32, -s1, s1)
    b1 = jax.random.uniform(ks[5], (1, 128), jnp.float32, -s1, s1)
    s2 = 1.0 / jnp.sqrt(128.0)
    w2 = jax.random.uniform(ks[6], (128, 6), jnp.float32, -s2, s2)
    b2 = jax.random.uniform(ks[7], (1, 6), jnp.float32, -s2, s2)
    return {
        "w_ih_t": w_ih.T,                           # (D, 4H)
        "w_hh_t": w_hh.T,                           # (H, 4H)
        "b_all": (b_ih + b_hh).reshape(1, H4),      # (1, 4H)
        "w1": w1, "b1": b1, "w2": w2, "b2": b2,
    }


# ----------------------------------------------------------------------------
# Pure-JAX reference (for correctness check).
# ----------------------------------------------------------------------------
def reference_forward(x_btd, params):
    B, T, D = x_btd.shape
    H = params["w_hh_t"].shape[0]

    def step(carry, x_t):
        h, c = carry
        gates = x_t @ params["w_ih_t"] + h @ params["w_hh_t"] + params["b_all"]
        i_g = jax.nn.sigmoid(gates[:, 0 * H:1 * H])
        f_g = jax.nn.sigmoid(gates[:, 1 * H:2 * H])
        g_g = jnp.tanh(gates[:, 2 * H:3 * H])
        o_g = jax.nn.sigmoid(gates[:, 3 * H:4 * H])
        c = f_g * c + i_g * g_g
        h = o_g * jnp.tanh(c)
        return (h, c), h

    h0 = jnp.zeros((B, H), jnp.float32)
    c0 = jnp.zeros((B, H), jnp.float32)
    _, hs = jax.lax.scan(step, (h0, c0), jnp.transpose(x_btd, (1, 0, 2)))
    flat = jnp.transpose(hs, (1, 0, 2)).reshape(B, -1)
    h = jnp.maximum(flat @ params["w1"] + params["b1"], 0.0)
    return h @ params["w2"] + params["b2"]


if __name__ == "__main__":
    input_dim, hidden_dim, time_length = 4, 32, 8
    batch = 2

    key = jax.random.PRNGKey(0)
    k_x, k_p = jax.random.split(key)
    x = jax.random.normal(k_x, (batch, time_length, input_dim), jnp.float32)
    params = init_params(k_p, input_dim, hidden_dim, time_length)

    out = jax.jit(lstm_net_forward)(x, params)
    out = jax.block_until_ready(out)

    ref = reference_forward(x, params)
    assert out.shape == (batch, 6), out.shape
    assert jnp.allclose(out, ref, atol=1e-4, rtol=1e-4), float(jnp.max(jnp.abs(out - ref)))

    print("KERNEL_OK")
</pallas_src>

<mosaic_0001>
module attributes {stable_mosaic.version = 11 : i64} {
  func.func @lstm_net_kernel(%arg0: i32, %arg1: memref<16x4xf32, #tpu.memory_space<vmem>>, %arg2: memref<4x128xf32, #tpu.memory_space<vmem>>, %arg3: memref<32x128xf32, #tpu.memory_space<vmem>>, %arg4: memref<1x128xf32, #tpu.memory_space<vmem>>, %arg5: memref<256x128xf32, #tpu.memory_space<vmem>>, %arg6: memref<1x128xf32, #tpu.memory_space<vmem>>, %arg7: memref<128x6xf32, #tpu.memory_space<vmem>>, %arg8: memref<1x6xf32, #tpu.memory_space<vmem>>, %arg9: memref<2x6xf32, #tpu.memory_space<vmem>>) attributes {dimension_semantics = [#tpu.dimension_semantics<parallel>], iteration_bounds = array<i64: 1>, scalar_prefetch = 0 : i64, scratch_operands = 0 : i64, tpu.core_type = #tpu.core_type<tc>, window_params = [{transform_indices = @transform_0, window_bounds = array<i64: 16, 4>}, {pipeline_mode = #tpu.pipeline_mode<synchronous>, transform_indices = @transform_1, window_bounds = array<i64: 4, 128>}, {pipeline_mode = #tpu.pipeline_mode<synchronous>, transform_indices = @transform_2, window_bounds = array<i64: 32, 128>}, {pipeline_mode = #tpu.pipeline_mode<synchronous>, transform_indices = @transform_3, window_bounds = array<i64: 1, 128>}, {pipeline_mode = #tpu.pipeline_mode<synchronous>, transform_indices = @transform_4, window_bounds = array<i64: 256, 128>}, {pipeline_mode = #tpu.pipeline_mode<synchronous>, transform_indices = @transform_5, window_bounds = array<i64: 1, 128>}, {pipeline_mode = #tpu.pipeline_mode<synchronous>, transform_indices = @transform_6, window_bounds = array<i64: 128, 6>}, {pipeline_mode = #tpu.pipeline_mode<synchronous>, transform_indices = @transform_7, window_bounds = array<i64: 1, 6>}, {transform_indices = @transform_8, window_bounds = array<i64: 2, 6>}]} {
    %c0 = arith.constant 0 : index
    %c0_0 = arith.constant 0 : index
    %0 = vector.load %arg1[%c0, %c0_0] : memref<16x4xf32, #tpu.memory_space<vmem>>, vector<16x4xf32>
    %c0_1 = arith.constant 0 : index
    %c0_2 = arith.constant 0 : index
    %1 = vector.load %arg2[%c0_1, %c0_2] : memref<4x128xf32, #tpu.memory_space<vmem>>, vector<4x128xf32>
    %cst = arith.constant dense<0.000000e+00> : vector<16x128xf32>
    %2 = tpu.matmul %0, %1, %cst {dimension_numbers = #tpu.dot_dimension_numbers<[1], [0], [0], [1], [0, 0, 1, 1], [], []>} : vector<16x4xf32>, vector<4x128xf32>, vector<16x128xf32> -> vector<16x128xf32>
    %c0_3 = arith.constant 0 : index
    %c0_4 = arith.constant 0 : index
    %3 = vector.load %arg4[%c0_3, %c0_4] : memref<1x128xf32, #tpu.memory_space<vmem>>, vector<1x128xf32>
    %4 = vector.broadcast %3 : vector<1x128xf32> to vector<16x128xf32>
    %5 = arith.addf %2, %4 : vector<16x128xf32>
    %c0_5 = arith.constant 0 : index
    %c0_6 = arith.constant 0 : index
    %6 = vector.load %arg3[%c0_5, %c0_6] : memref<32x128xf32, #tpu.memory_space<vmem>>, vector<32x128xf32>
    %cst_7 = arith.constant 0.000000e+00 : f32
    %7 = vector.broadcast %cst_7 : f32 to vector<2x32xf32>
    %cst_8 = arith.constant 0.000000e+00 : f32
    %8 = vector.broadcast %cst_8 : f32 to vector<2x32xf32>
    %9 = vector.extract_strided_slice %5 {offsets = [0, 0], sizes = [2, 128], strides = [1, 1]} : vector<16x128xf32> to vector<2x128xf32>
    %cst_9 = arith.constant dense<0.000000e+00> : vector<2x128xf32>
    %10 = tpu.matmul %7, %6, %cst_9 {dimension_numbers = #tpu.dot_dimension_numbers<[1], [0], [0], [1], [0, 0, 1, 1], [], []>} : vector<2x32xf32>, vector<32x128xf32>, vector<2x128xf32> -> vector<2x128xf32>
    %11 = arith.addf %9, %10 : vector<2x128xf32>
    %12 = arith.negf %11 : vector<2x128xf32>
    %13 = math.exp %12 : vector<2x128xf32>
    %cst_10 = arith.constant 1.000000e+00 : f32
    %14 = vector.broadcast %cst_10 : f32 to vector<2x128xf32>
    %15 = arith.addf %14, %13 : vector<2x128xf32>
    %16 = arith.divf %14, %15 : vector<2x128xf32>
    %17 = vector.extract_strided_slice %16 {offsets = [0, 0], sizes = [2, 32], strides = [1, 1]} : vector<2x128xf32> to vector<2x32xf32>
    %18 = vector.extract_strided_slice %16 {offsets = [0, 32], sizes = [2, 32], strides = [1, 1]} : vector<2x128xf32> to vector<2x32xf32>
    %19 = vector.extract_strided_slice %16 {offsets = [0, 96], sizes = [2, 32], strides = [1, 1]} : vector<2x128xf32> to vector<2x32xf32>
    %20 = vector.extract_strided_slice %11 {offsets = [0, 64], sizes = [2, 32], strides = [1, 1]} : vector<2x128xf32> to vector<2x32xf32>
    %21 = math.tanh %20 : vector<2x32xf32>
    %22 = arith.mulf %18, %8 : vector<2x32xf32>
    %23 = arith.mulf %17, %21 : vector<2x32xf32>
    %24 = arith.addf %22, %23 : vector<2x32xf32>
    %25 = math.tanh %24 : vector<2x32xf32>
    %26 = arith.mulf %19, %25 : vector<2x32xf32>
    %27 = vector.extract_strided_slice %5 {offsets = [2, 0], sizes = [2, 128], strides = [1, 1]} : vector<16x128xf32> to vector<2x128xf32>
    %cst_11 = arith.constant dense<0.000000e+00> : vector<2x128xf32>
    %28 = tpu.matmul %26, %6, %cst_11 {dimension_numbers = #tpu.dot_dimension_numbers<[1], [0], [0], [1], [0, 0, 1, 1], [], []>} : vector<2x32xf32>, vector<32x128xf32>, vector<2x128xf32> -> vector<2x128xf32>
    %29 = arith.addf %27, %28 : vector<2x128xf32>
    %30 = arith.negf %29 : vector<2x128xf32>
    %31 = math.exp %30 : vector<2x128xf32>
    %cst_12 = arith.constant 1.000000e+00 : f32
    %32 = vector.broadcast %cst_12 : f32 to vector<2x128xf32>
    %33 = arith.addf %32, %31 : vector<2x128xf32>
    %34 = arith.divf %32, %33 : vector<2x128xf32>
    %35 = vector.extract_strided_slice %34 {offsets = [0, 0], sizes = [2, 32], strides = [1, 1]} : vector<2x128xf32> to vector<2x32xf32>
    %36 = vector.extract_strided_slice %34 {offsets = [0, 32], sizes = [2, 32], strides = [1, 1]} : vector<2x128xf32> to vector<2x32xf32>
    %37 = vector.extract_strided_slice %34 {offsets = [0, 96], sizes = [2, 32], strides = [1, 1]} : vector<2x128xf32> to vector<2x32xf32>
    %38 = vector.extract_strided_slice %29 {offsets = [0, 64], sizes = [2, 32], strides = [1, 1]} : vector<2x128xf32> to vector<2x32xf32>
    %39 = math.tanh %38 : vector<2x32xf32>
    %40 = arith.mulf %36, %24 : vector<2x32xf32>
    %41 = arith.mulf %35, %39 : vector<2x32xf32>
    %42 = arith.addf %40, %41 : vector<2x32xf32>
    %43 = math.tanh %42 : vector<2x32xf32>
    %44 = arith.mulf %37, %43 : vector<2x32xf32>
    %45 = vector.extract_strided_slice %5 {offsets = [4, 0], sizes = [2, 128], strides = [1, 1]} : vector<16x128xf32> to vector<2x128xf32>
    %cst_13 = arith.constant dense<0.000000e+00> : vector<2x128xf32>
    %46 = tpu.matmul %44, %6, %cst_13 {dimension_numbers = #tpu.dot_dimension_numbers<[1], [0], [0], [1], [0, 0, 1, 1], [], []>} : vector<2x32xf32>, vector<32x128xf32>, vector<2x128xf32> -> vector<2x128xf32>
    %47 = arith.addf %45, %46 : vector<2x128xf32>
    %48 = arith.negf %47 : vector<2x128xf32>
    %49 = math.exp %48 : vector<2x128xf32>
    %cst_14 = arith.constant 1.000000e+00 : f32
    %50 = vector.broadcast %cst_14 : f32 to vector<2x128xf32>
    %51 = arith.addf %50, %49 : vector<2x128xf32>
    %52 = arith.divf %50, %51 : vector<2x128xf32>
    %53 = vector.extract_strided_slice %52 {offsets = [0, 0], sizes = [2, 32], strides = [1, 1]} : vector<2x128xf32> to vector<2x32xf32>
    %54 = vector.extract_strided_slice %52 {offsets = [0, 32], sizes = [2, 32], strides = [1, 1]} : vector<2x128xf32> to vector<2x32xf32>
    %55 = vector.extract_strided_slice %52 {offsets = [0, 96], sizes = [2, 32], strides = [1, 1]} : vector<2x128xf32> to vector<2x32xf32>
    %56 = vector.extract_strided_slice %47 {offsets = [0, 64], sizes = [2, 32], strides = [1, 1]} : vector<2x128xf32> to vector<2x32xf32>
    %57 = math.tanh %56 : vector<2x32xf32>
    %58 = arith.mulf %54, %42 : vector<2x32xf32>
    %59 = arith.mulf %53, %57 : vector<2x32xf32>
    %60 = arith.addf %58, %59 : vector<2x32xf32>
    %61 = math.tanh %60 : vector<2x32xf32>
    %62 = arith.mulf %55, %61 : vector<2x32xf32>
    %63 = vector.extract_strided_slice %5 {offsets = [6, 0], sizes = [2, 128], strides = [1, 1]} : vector<16x128xf32> to vector<2x128xf32>
    %cst_15 = arith.constant dense<0.000000e+00> : vector<2x128xf32>
    %64 = tpu.matmul %62, %6, %cst_15 {dimension_numbers = #tpu.dot_dimension_numbers<[1], [0], [0], [1], [0, 0, 1, 1], [], []>} : vector<2x32xf32>, vector<32x128xf32>, vector<2x128xf32> -> vector<2x128xf32>
    %65 = arith.addf %63, %64 : vector<2x128xf32>
    %66 = arith.negf %65 : vector<2x128xf32>
    %67 = math.exp %66 : vector<2x128xf32>
    %cst_16 = arith.constant 1.000000e+00 : f32
    %68 = vector.broadcast %cst_16 : f32 to vector<2x128xf32>
    %69 = arith.addf %68, %67 : vector<2x128xf32>
    %70 = arith.divf %68, %69 : vector<2x128xf32>
    %71 = vector.extract_strided_slice %70 {offsets = [0, 0], sizes = [2, 32], strides = [1, 1]} : vector<2x128xf32> to vector<2x32xf32>
    %72 = vector.extract_strided_slice %70 {offsets = [0, 32], sizes = [2, 32], strides = [1, 1]} : vector<2x128xf32> to vector<2x32xf32>
    %73 = vector.extract_strided_slice %70 {offsets = [0, 96], sizes = [2, 32], strides = [1, 1]} : vector<2x128xf32> to vector<2x32xf32>
    %74 = vector.extract_strided_slice %65 {offsets = [0, 64], sizes = [2, 32], strides = [1, 1]} : vector<2x128xf32> to vector<2x32xf32>
    %75 = math.tanh %74 : vector<2x32xf32>
    %76 = arith.mulf %72, %60 : vector<2x32xf32>
    %77 = arith.mulf %71, %75 : vector<2x32xf32>
    %78 = arith.addf %76, %77 : vector<2x32xf32>
    %79 = math.tanh %78 : vector<2x32xf32>
    %80 = arith.mulf %73, %79 : vector<2x32xf32>
    %81 = vector.extract_strided_slice %5 {offsets = [8, 0], sizes = [2, 128], strides = [1, 1]} : vector<16x128xf32> to vector<2x128xf32>
    %cst_17 = arith.constant dense<0.000000e+00> : vector<2x128xf32>
    %82 = tpu.matmul %80, %6, %cst_17 {dimension_numbers = #tpu.dot_dimension_numbers<[1], [0], [0], [1], [0, 0, 1, 1], [], []>} : vector<2x32xf32>, vector<32x128xf32>, vector<2x128xf32> -> vector<2x128xf32>
    %83 = arith.addf %81, %82 : vector<2x128xf32>
    %84 = arith.negf %83 : vector<2x128xf32>
    %85 = math.exp %84 : vector<2x128xf32>
    %cst_18 = arith.constant 1.000000e+00 : f32
    %86 = vector.broadcast %cst_18 : f32 to vector<2x128xf32>
    %87 = arith.addf %86, %85 : vector<2x128xf32>
    %88 = arith.divf %86, %87 : vector<2x128xf32>
    %89 = vector.extract_strided_slice %88 {offsets = [0, 0], sizes = [2, 32], strides = [1, 1]} : vector<2x128xf32> to vector<2x32xf32>
    %90 = vector.extract_strided_slice %88 {offsets = [0, 32], sizes = [2, 32], strides = [1, 1]} : vector<2x128xf32> to vector<2x32xf32>
    %91 = vector.extract_strided_slice %88 {offsets = [0, 96], sizes = [2, 32], strides = [1, 1]} : vector<2x128xf32> to vector<2x32xf32>
    %92 = vector.extract_strided_slice %83 {offsets = [0, 64], sizes = [2, 32], strides = [1, 1]} : vector<2x128xf32> to vector<2x32xf32>
    %93 = math.tanh %92 : vector<2x32xf32>
    %94 = arith.mulf %90, %78 : vector<2x32xf32>
    %95 = arith.mulf %89, %93 : vector<2x32xf32>
    %96 = arith.addf %94, %95 : vector<2x32xf32>
    %97 = math.tanh %96 : vector<2x32xf32>
    %98 = arith.mulf %91, %97 : vector<2x32xf32>
    %99 = vector.extract_strided_slice %5 {offsets = [10, 0], sizes = [2, 128], strides = [1, 1]} : vector<16x128xf32> to vector<2x128xf32>
    %cst_19 = arith.constant dense<0.000000e+00> : vector<2x128xf32>
    %100 = tpu.matmul %98, %6, %cst_19 {dimension_numbers = #tpu.dot_dimension_numbers<[1], [0], [0], [1], [0, 0, 1, 1], [], []>} : vector<2x32xf32>, vector<32x128xf32>, vector<2x128xf32> -> vector<2x128xf32>
    %101 = arith.addf %99, %100 : vector<2x128xf32>
    %102 = arith.negf %101 : vector<2x128xf32>
    %103 = math.exp %102 : vector<2x128xf32>
    %cst_20 = arith.constant 1.000000e+00 : f32
    %104 = vector.broadcast %cst_20 : f32 to vector<2x128xf32>
    %105 = arith.addf %104, %103 : vector<2x128xf32>
    %106 = arith.divf %104, %105 : vector<2x128xf32>
    %107 = vector.extract_strided_slice %106 {offsets = [0, 0], sizes = [2, 32], strides = [1, 1]} : vector<2x128xf32> to vector<2x32xf32>
    %108 = vector.extract_strided_slice %106 {offsets = [0, 32], sizes = [2, 32], strides = [1, 1]} : vector<2x128xf32> to vector<2x32xf32>
    %109 = vector.extract_strided_slice %106 {offsets = [0, 96], sizes = [2, 32], strides = [1, 1]} : vector<2x128xf32> to vector<2x32xf32>
    %110 = vector.extract_strided_slice %101 {offsets = [0, 64], sizes = [2, 32], strides = [1, 1]} : vector<2x128xf32> to vector<2x32xf32>
    %111 = math.tanh %110 : vector<2x32xf32>
    %112 = arith.mulf %108, %96 : vector<2x32xf32>
    %113 = arith.mulf %107, %111 : vector<2x32xf32>
    %114 = arith.addf %112, %113 : vector<2x32xf32>
    %115 = math.tanh %114 : vector<2x32xf32>
    %116 = arith.mulf %109, %115 : vector<2x32xf32>
    %117 = vector.extract_strided_slice %5 {offsets = [12, 0], sizes = [2, 128], strides = [1, 1]} : vector<16x128xf32> to vector<2x128xf32>
    %cst_21 = arith.constant dense<0.000000e+00> : vector<2x128xf32>
    %118 = tpu.matmul %116, %6, %cst_21 {dimension_numbers = #tpu.dot_dimension_numbers<[1], [0], [0], [1], [0, 0, 1, 1], [], []>} : vector<2x32xf32>, vector<32x128xf32>, vector<2x128xf32> -> vector<2x128xf32>
    %119 = arith.addf %117, %118 : vector<2x128xf32>
    %120 = arith.negf %119 : vector<2x128xf32>
    %121 = math.exp %120 : vector<2x128xf32>
    %cst_22 = arith.constant 1.000000e+00 : f32
    %122 = vector.broadcast %cst_22 : f32 to vector<2x128xf32>
    %123 = arith.addf %122, %121 : vector<2x128xf32>
    %124 = arith.divf %122, %123 : vector<2x128xf32>
    %125 = vector.extract_strided_slice %124 {offsets = [0, 0], sizes = [2, 32], strides = [1, 1]} : vector<2x128xf32> to vector<2x32xf32>
    %126 = vector.extract_strided_slice %124 {offsets = [0, 32], sizes = [2, 32], strides = [1, 1]} : vector<2x128xf32> to vector<2x32xf32>
    %127 = vector.extract_strided_slice %124 {offsets = [0, 96], sizes = [2, 32], strides = [1, 1]} : vector<2x128xf32> to vector<2x32xf32>
    %128 = vector.extract_strided_slice %119 {offsets = [0, 64], sizes = [2, 32], strides = [1, 1]} : vector<2x128xf32> to vector<2x32xf32>
    %129 = math.tanh %128 : vector<2x32xf32>
    %130 = arith.mulf %126, %114 : vector<2x32xf32>
    %131 = arith.mulf %125, %129 : vector<2x32xf32>
    %132 = arith.addf %130, %131 : vector<2x32xf32>
    %133 = math.tanh %132 : vector<2x32xf32>
    %134 = arith.mulf %127, %133 : vector<2x32xf32>
    %135 = vector.extract_strided_slice %5 {offsets = [14, 0], sizes = [2, 128], strides = [1, 1]} : vector<16x128xf32> to vector<2x128xf32>
    %cst_23 = arith.constant dense<0.000000e+00> : vector<2x128xf32>
    %136 = tpu.matmul %134, %6, %cst_23 {dimension_numbers = #tpu.dot_dimension_numbers<[1], [0], [0], [1], [0, 0, 1, 1], [], []>} : vector<2x32xf32>, vector<32x128xf32>, vector<2x128xf32> -> vector<2x128xf32>
    %137 = arith.addf %135, %136 : vector<2x128xf32>
    %138 = arith.negf %137 : vector<2x128xf32>
    %139 = math.exp %138 : vector<2x128xf32>
    %cst_24 = arith.constant 1.000000e+00 : f32
    %140 = vector.broadcast %cst_24 : f32 to vector<2x128xf32>
    %141 = arith.addf %140, %139 : vector<2x128xf32>
    %142 = arith.divf %140, %141 : vector<2x128xf32>
    %143 = vector.extract_strided_slice %142 {offsets = [0, 0], sizes = [2, 32], strides = [1, 1]} : vector<2x128xf32> to vector<2x32xf32>
    %144 = vector.extract_strided_slice %142 {offsets = [0, 32], sizes = [2, 32], strides = [1, 1]} : vector<2x128xf32> to vector<2x32xf32>
    %145 = vector.extract_strided_slice %142 {offsets = [0, 96], sizes = [2, 32], strides = [1, 1]} : vector<2x128xf32> to vector<2x32xf32>
    %146 = vector.extract_strided_slice %137 {offsets = [0, 64], sizes = [2, 32], strides = [1, 1]} : vector<2x128xf32> to vector<2x32xf32>
    %147 = math.tanh %146 : vector<2x32xf32>
    %148 = arith.mulf %144, %132 : vector<2x32xf32>
    %149 = arith.mulf %143, %147 : vector<2x32xf32>
    %150 = arith.addf %148, %149 : vector<2x32xf32>
    %151 = math.tanh %150 : vector<2x32xf32>
    %152 = arith.mulf %145, %151 : vector<2x32xf32>
    %153 = tpu.concatenate %26, %44, %62, %80, %98, %116, %134, %152 in 1 : vector<2x32xf32>, vector<2x32xf32>, vector<2x32xf32>, vector<2x32xf32>, vector<2x32xf32>, vector<2x32xf32>, vector<2x32xf32>, vector<2x32xf32> -> vector<2x256xf32>
    %c0_25 = arith.constant 0 : index
    %c0_26 = arith.constant 0 : index
    %154 = vector.load %arg5[%c0_25, %c0_26] : memref<256x128xf32, #tpu.memory_space<vmem>>, vector<256x128xf32>
    %cst_27 = arith.constant dense<0.000000e+00> : vector<2x128xf32>
    %155 = tpu.matmul %153, %154, %cst_27 {dimension_numbers = #tpu.dot_dimension_numbers<[1], [0], [0], [1], [0, 0, 1, 1], [], []>} : vector<2x256xf32>, vector<256x128xf32>, vector<2x128xf32> -> vector<2x128xf32>
    %c0_28 = arith.constant 0 : index
    %c0_29 = arith.constant 0 : index
    %156 = vector.load %arg6[%c0_28, %c0_29] : memref<1x128xf32, #tpu.memory_space<vmem>>, vector<1x128xf32>
    %157 = vector.broadcast %156 : vector<1x128xf32> to vector<2x128xf32>
    %158 = arith.addf %155, %157 : vector<2x128xf32>
    %cst_30 = arith.constant 0.000000e+00 : f32
    %159 = vector.broadcast %cst_30 : f32 to vector<2x128xf32>
    %160 = arith.maximumf %158, %159 : vector<2x128xf32>
    %c0_31 = arith.constant 0 : index
    %c0_32 = arith.constant 0 : index
    %161 = vector.load %arg7[%c0_31, %c0_32] : memref<128x6xf32, #tpu.memory_space<vmem>>, vector<128x6xf32>
    %cst_33 = arith.constant dense<0.000000e+00> : vector<2x6xf32>
    %162 = tpu.matmul %160, %161, %cst_33 {dimension_numbers = #tpu.dot_dimension_numbers<[1], [0], [0], [1], [0, 0, 1, 1], [], []>} : vector<2x128xf32>, vector<128x6xf32>, vector<2x6xf32> -> vector<2x6xf32>
    %c0_34 = arith.constant 0 : index
    %c0_35 = arith.constant 0 : index
    %163 = vector.load %arg8[%c0_34, %c0_35] : memref<1x6xf32, #tpu.memory_space<vmem>>, vector<1x6xf32>
    %164 = vector.broadcast %163 : vector<1x6xf32> to vector<2x6xf32>
    %165 = arith.addf %162, %164 : vector<2x6xf32>
    %c0_36 = arith.constant 0 : index
    %c0_37 = arith.constant 0 : index
    %166 = vector.load %arg9[%c0_36, %c0_37] : memref<2x6xf32, #tpu.memory_space<vmem>>, vector<2x6xf32>
    tpu.vector_store %arg9[%c0_36, %c0_37], %165 {strides = array<i32>} : memref<2x6xf32, #tpu.memory_space<vmem>>, vector<2x6xf32>,
    return
  }
  func.func @transform_0(%arg0: i32) -> (i32, i32) {
    %c0_i32 = arith.constant 0 : i32
    %c0_i32_0 = arith.constant 0 : i32
    return %arg0, %c0_i32 : i32, i32
  }
  func.func @transform_1(%arg0: i32) -> (i32, i32) {
    %c0_i32 = arith.constant 0 : i32
    %c0_i32_0 = arith.constant 0 : i32
    %c0_i32_1 = arith.constant 0 : i32
    return %c0_i32, %c0_i32_0 : i32, i32
  }
  func.func @transform_2(%arg0: i32) -> (i32, i32) {
    %c0_i32 = arith.constant 0 : i32
    %c0_i32_0 = arith.constant 0 : i32
    %c0_i32_1 = arith.constant 0 : i32
    return %c0_i32, %c0_i32_0 : i32, i32
  }
  func.func @transform_3(%arg0: i32) -> (i32, i32) {
    %c0_i32 = arith.constant 0 : i32
    %c0_i32_0 = arith.constant 0 : i32
    %c0_i32_1 = arith.constant 0 : i32
    return %c0_i32, %c0_i32_0 : i32, i32
  }
  func.func @transform_4(%arg0: i32) -> (i32, i32) {
    %c0_i32 = arith.constant 0 : i32
    %c0_i32_0 = arith.constant 0 : i32
    %c0_i32_1 = arith.constant 0 : i32
    return %c0_i32, %c0_i32_0 : i32, i32
  }
  func.func @transform_5(%arg0: i32) -> (i32, i32) {
    %c0_i32 = arith.constant 0 : i32
    %c0_i32_0 = arith.constant 0 : i32
    %c0_i32_1 = arith.constant 0 : i32
    return %c0_i32, %c0_i32_0 : i32, i32
  }
  func.func @transform_6(%arg0: i32) -> (i32, i32) {
    %c0_i32 = arith.constant 0 : i32
    %c0_i32_0 = arith.constant 0 : i32
    %c0_i32_1 = arith.constant 0 : i32
    return %c0_i32, %c0_i32_0 : i32, i32
  }
  func.func @transform_7(%arg0: i32) -> (i32, i32) {
    %c0_i32 = arith.constant 0 : i32
    %c0_i32_0 = arith.constant 0 : i32
    %c0_i32_1 = arith.constant 0 : i32
    return %c0_i32, %c0_i32_0 : i32, i32
  }
  func.func @transform_8(%arg0: i32) -> (i32, i32) {
    %c0_i32 = arith.constant 0 : i32
    %c0_i32_0 = arith.constant 0 : i32
    return %arg0, %c0_i32 : i32, i32
  }
}

</mosaic_0001>

<bundles_post_ra>
// kernel: lstm_net_forward.1
= control target key start
LH: loop header
LB: loop body
LE: loop exit
PB: predicated region body
PF: predicated region fallthrough
CT: control target
= control target key end

     0   :  { %13 = vsyncpa [#allocation3], 0  ;;  %s2031_s0 = inlined_call_operand.vmem [shape: f32[16,4], index: 0, kind: input, shape index: {}]   ;;  %s2032_s1 = inlined_call_operand.vmem [shape: f32[4,128], index: 1, kind: input, shape index: {}]   ;;  %s2033_s2 = inlined_call_operand.vmem [shape: f32[32,128], index: 2, kind: input, shape index: {}]   ;;  %s2034_s3 = inlined_call_operand.vmem [shape: f32[1,128], index: 3, kind: input, shape index: {}]   ;;  %s2035_s4 = inlined_call_operand.hbm [shape: f32[256,128], index: 4, kind: input, shape index: {}]   ;;  %s2036_s5 = inlined_call_operand.vmem [shape: f32[1,128], index: 5, kind: input, shape index: {}]   ;;  %s2037_s6 = inlined_call_operand.vmem [shape: f32[128,6], index: 6, kind: input, shape index: {}]   ;;  %s2038_s7 = inlined_call_operand.vmem [shape: f32[1,6], index: 7, kind: input, shape index: {}]   ;;  %s2039_s8 = inlined_call_operand.hbm [shape: f32[2,6], index: 8, kind: output, shape index: {}]  }
   0x1   :  { %14 = vsyncpa [#allocation4], 0  ;;  %s1713_s27 = smov [#allocation2]   ;;  %s1665_s9 = scalar_lea.hbm %s2035_s4, 4096 }
   0x2   :  { %s28_s28 = sshll.u32 %s1713_s27, 4  ;;  %p1666_p0 = scmp.ne.s32.totalorder %s2035_s4, %s1665_s9  ;;  %s29_s28 = int_to_ptr.vmem [resolvable:$true] %s28_s28 }
   0x3   :  { %p1669_p1 = scmp.lt.u32.totalorder %s1665_s9, %s2035_s4 }
   0x5   :  { %p1671_p2 = pnand %p1669_p1, %p1666_p0 }
   0x7   :  { %1674 = shalt.err (!%p1671_p2)
}
   0x8   :  { %s1675_s14 = scalar_lea.vmem %s29_s28, 4096  ;;  %p1680_p4 = scmp.lt.s32.totalorder %s29_s28, %s29_s28 }
   0x9   :  { %p1676_p3 = scmp.ne.s32.totalorder %s29_s28, %s1675_s14  ;;  %p1681_p5 = scmp.lt.s32.totalorder %s1675_s14, %s1675_s14 }
   0xb   :  { %p1682_p6 = por %p1681_p5, %p1680_p4 }
   0xd   :  { %p1683_p7 = pnand %p1682_p6, %p1676_p3 }
   0xf   :  { %1686 = shalt.err (!%p1683_p7)
}
  0x10   :  { %s1714_s15 = smov 128   ;;  %s1715_s16 = smov 8  }
  0x11   :  { %34 = dma.hbm_to_vmem [thread:$0]  %s2035_s4, 4096, %s29_s28, [#allocation3], %s1714_s15, %s1714_s15, %s1715_s16  }
  0x12   :  { %1709 = dma.done.wait [#allocation3], 4096  }
  0x13   :  { %1710 = vsyncadd [#allocation3], 4294963200  ;;  %v1716_v0 = vmov 0.0|0.0   ;;  %vm1717_vm0 = vmmov 0   ;;  %v1718_v1 = vmov 0.0   ;;  %vm61_vm1 = vcmask 1043456  }
  0x14   :  { %1477 = vmatprep.subr.bf16.mxu1 %v1716_v0  ;;  %1362 = vmatprep.mubr.msk.f32.mxu1 %vm1717_vm0, %v1718_v1  ;;  %vm54_vm2 = vcmask 31744   ;;  %v140_v2 = vld [vmem:[%s2033_s2] sm:$0xff]  ;;  %v141_v3 = vld [vmem:[%s2033_s2 + $0x8] sm:$0xff]  ;;  %v142_v8 = vld [vmem:[%s2033_s2 + $0x10] sm:$0xff]  ;;  %vm144_vm3 = vcmask 261120   ;;  %s1721_s22 = smov 96  }
  0x15   :  { %v46_v4 = vld [vmem:[%s2032_s1] sm:$0xf]  ;;  %v1792_v5 = vpack.c.bf16 %v141_v3, %v140_v2  ;;  %v45_v7 = vld [vmem:[%s2031_s0 + $0x8] sm:$0xff]  ;;  %v143_v9 = vld [vmem:[%s2033_s2 + $0x18] sm:$0xff]  ;;  %s1719_s2 = smov 64   ;;  %vm1006_vm4 = vcmask 523264  }
  0x16   :  { %1349 = vmatprep.subr.msk.mxu0 %vm61_vm1, %v46_v4  ;;  %v44_v6 = vld [vmem:[%s2031_s0] sm:$0xff]  ;;  %v1807_v10 = vpack.c.bf16 %v143_v9, %v142_v8  ;;  %vm1008_vm5 = vcmask 785408   ;;  %s1722_s20 = smov [#allocation5]   ;;  %vm1216_vm6 = vcmask 41984  }
  0x17   :  { %1350 = vmatpush3.msk.msra.mxu0 %vm61_vm1, %v46_v4  ;;  %1351 = vmatprep.mubr.msk.f32.mxu0 %vm54_vm2, %v44_v6  ;;  %v1233_v11 = vld [vmem:[%s2034_s3] ss:$0 sm:$0xff]  ;;  %s1720_s3 = smov 32   ;;  %s1224_s21 = sshll.u32 %s1722_s20, 4  ;;  %s1225_s21 = int_to_ptr.vmem [resolvable:$true] %s1224_s21 }
  0x18   :  { %1479 = vmatpush3.bf16.msra.mxu1 %v1792_v5  ;;  %1352 = vmatmul.mubr.msk.f32.vlgmr.msra.gmra.mrb[0].mxu0 %vm54_vm2, %v45_v7  ;;  %p1692_p9 = scmp.lt.s32.totalorder %s1225_s21, %s1225_s21 }
  0x19   :  { %1480 = vmatprep.subr.bf16.mxu1 %v1716_v0  ;;  %1483 = vmatprep.subr.bf16.mxu0 %v1716_v0 }
  0x1a   :  { %1485 = vmatpush3.bf16.msra.mxu0 %v1792_v5  ;;  %1373 = vmatprep.mubr.msk.f32.mxu0 %vm1717_vm0, %v1718_v1 }
  0x1b   :  { %1486 = vmatprep.subr.bf16.mxu0 %v1716_v0 }
  0x1c   :  { %1482 = vmatpush3.bf16.msra.mxu1 %v1807_v10 }
  0x1d   :  { %1489 = vmatprep.subr.bf16.mxu1 %v1716_v0 }
  0x1e   :  { %1488 = vmatpush3.bf16.msra.mxu0 %v1807_v10 }
  0x1f   :  { %1363 = vmatmul.mubr.f32.vlgmr.msra.gmra.mrb[0].mxu1 %v1718_v1  ;;  %1495 = vmatprep.subr.bf16.mxu0 %v1716_v0 }
  0x20   :  { %1491 = vmatpush3.bf16.msra.mxu1 %v1792_v5  ;;  %1384 = vmatprep.mubr.msk.f32.mxu1 %vm1717_vm0, %v1718_v1 }
  0x21   :  { %1492 = vmatprep.subr.bf16.mxu1 %v1716_v0 }
  0x24   :  { %1494 = vmatpush3.bf16.msra.mxu1 %v1807_v10 }
  0x25   :  { %1501 = vmatprep.subr.bf16.mxu1 %v1716_v0 }
  0xeb   :  { %v1353_v12 = vpop.f32.mrb[0].mxu0 }
  0xec   :  { %v1829_v13 = vadd.f32 %v1353_v12, %v1233_v11  ;;  %v131_v14 = vpop.f32.mrb[1].mxu0 }
  0xed   :  { %v1831_v15 = vadd.f32 %v1233_v11, %v131_v14 }
  0xf2   :  { %v214_v16 = vpop.f32.mrb[0].mxu1 }
  0xf3   :  { %v218_v17 = vadd.f32 %v214_v16, %v1831_v15  ;;  %v1364_v18 = vpop.f32.mrb[1].mxu1 }
  0xf5   :  { %1601 = vtanh.f32 %v218_v17  ;;  %v1237_v20 = vmul.f32 -1.442695, %v218_v17 }
  0xf7   :  { %1603 = vpow2.f32 %v1237_v20 }
  0xff   :  { %v1602_v19 = vpop.eup %1601 }
 0x100   :  { %228 = vrot.lane.b32.xlu0 %v1602_v19, %s1719_s2 }
 0x101   :  { %v1604_v21 = vpop.eup %1603 }
 0x102   :  { %v222_v22 = vadd.f32 1.0, %v1604_v21 }
 0x104   :  { %1605 = vrcp.f32 %v222_v22 }
 0x10e   :  { %v1606_v23 = vpop.eup %1605 }
 0x10f   :  { %v226_v26 = vmul.f32 0.0, %v1606_v23 }
 0x172   :  { %v229_v24 = vpop.permute.xlu0 %228 }
 0x173   :  { %v231_v25 = vmul.f32 %v1606_v23, %v229_v24 }
 0x175   :  { %233 = vrot.lane.b32.xlu0 %v231_v25, %s1720_s3 }
 0x1e7   :  { %v234_v27 = vpop.permute.xlu0 %233 }
 0x1e8   :  { %v236_v28 = vadd.f32 %v234_v27, %v226_v26 }
 0x1ea   :  { %1607 = vtanh.f32 %v236_v28  ;;  %v330_v44 = vrot.slane %v236_v28, 6 }
 0x1f4   :  { %v1608_v29 = vpop.eup %1607 }
 0x1f5   :  { %239 = vrot.lane.b32.xlu1 %v1608_v29, %s1719_s2 }
 0x267   :  { %v240_v30 = vpop.permute.xlu1 %239 }
 0x268   :  { %v242_v31 = vmul.f32 %v1606_v23, %v240_v30 }
 0x26a   :  { %244 = vrot.lane.b32.xlu1 %v242_v31, %s1720_s3 }
 0x2dc   :  { %v1838_v32 = vpop.permute.xlu1 %244 }
 0x2dd   :  { %1374 = vmatmul.mubr.msk.f32.vlgmr.msra.gmra.mrb[2].mxu0 %vm144_vm3, %v1838_v32 }
 0x2de   :  { %1497 = vmatpush3.bf16.msra.mxu0 %v1792_v5  ;;  %1395 = vmatprep.mubr.msk.f32.mxu0 %vm1717_vm0, %v1718_v1 }
 0x2df   :  { %1498 = vmatprep.subr.bf16.mxu0 %v1716_v0 }
 0x2e2   :  { %1500 = vmatpush3.bf16.msra.mxu0 %v1807_v10 }
 0x2e3   :  { %1507 = vmatprep.subr.bf16.mxu0 %v1716_v0 }
 0x3b0   :  { %v314_v33 = vpop.f32.mrb[2].mxu0 }
 0x3b1   :  { %v319_v34 = vrot.slane %v314_v33, 6  ;;  %v1375_v35 = vpop.f32.mrb[3].mxu0 }
 0x3b3   :  { %v321_v36 = vadd.f32 %v319_v34, %v1831_v15 }
 0x3b5   :  { %1609 = vtanh.f32 %v321_v36  ;;  %v1239_v38 = vmul.f32 -1.442695, %v321_v36 }
 0x3b7   :  { %1611 = vpow2.f32 %v1239_v38 }
 0x3bf   :  { %v1610_v37 = vpop.eup %1609 }
 0x3c0   :  { %334 = vrot.lane.b32.xlu0 %v1610_v37, %s1719_s2 }
 0x3c1   :  { %v1612_v39 = vpop.eup %1611 }
 0x3c2   :  { %v325_v40 = vadd.f32 1.0, %v1612_v39 }
 0x3c4   :  { %1613 = vrcp.f32 %v325_v40 }
 0x3ce   :  { %v1614_v41 = vpop.eup %1613 }
 0x3cf   :  { %v332_v45 = vmul.f32 %v1614_v41, %v330_v44 }
 0x432   :  { %v335_v42 = vpop.permute.xlu0 %334 }
 0x433   :  { %v337_v43 = vmul.f32 %v1614_v41, %v335_v42 }
 0x435   :  { %339 = vrot.lane.b32.xlu1 %v337_v43, %s1720_s3 }
 0x4a7   :  { %v340_v46 = vpop.permute.xlu1 %339 }
 0x4a8   :  { %v342_v47 = vadd.f32 %v340_v46, %v332_v45 }
 0x4aa   :  { %1615 = vtanh.f32 %v342_v47  ;;  %v437_v2 = vrot.slane %v342_v47, 6 }
 0x4b4   :  { %v1616_v48 = vpop.eup %1615 }
 0x4b5   :  { %345 = vrot.lane.b32.xlu0 %v1616_v48, %s1719_s2 }
 0x527   :  { %v346_v49 = vpop.permute.xlu0 %345 }
 0x528   :  { %v1852_v50 = vmul.f32 %v1614_v41, %v346_v49 }
 0x52a   :  { %v350_v51 = vrot.slane %v1852_v50, 2 }
 0x52c   :  { %351 = vrot.lane.b32.xlu1 %v350_v51, %s1720_s3 }
 0x59e   :  { %v352_v52 = vpop.permute.xlu1 %351 }
 0x59f   :  { %1385 = vmatmul.mubr.msk.f32.vlgmr.msra.gmra.mrb[2].mxu1 %vm144_vm3, %v352_v52 }
 0x5a0   :  { %1503 = vmatpush3.bf16.msra.mxu1 %v1792_v5  ;;  %1406 = vmatprep.mubr.msk.f32.mxu1 %vm1717_vm0, %v1718_v1 }
 0x5a1   :  { %1504 = vmatprep.subr.bf16.mxu1 %v1716_v0 }
 0x5a4   :  { %1506 = vmatpush3.bf16.msra.mxu1 %v1807_v10 }
 0x5a5   :  { %1513 = vmatprep.subr.bf16.mxu1 %v1716_v0 }
 0x672   :  { %v421_v53 = vpop.f32.mrb[2].mxu1 }
 0x673   :  { %v426_v54 = vrot.slane %v421_v53, 4  ;;  %v1386_v55 = vpop.f32.mrb[3].mxu1 }
 0x675   :  { %v428_v56 = vadd.f32 %v426_v54, %v1831_v15 }
 0x677   :  { %1617 = vtanh.f32 %v428_v56  ;;  %v1241_v58 = vmul.f32 -1.442695, %v428_v56 }
 0x679   :  { %1619 = vpow2.f32 %v1241_v58 }
 0x681   :  { %v1618_v57 = vpop.eup %1617 }
 0x682   :  { %441 = vrot.lane.b32.xlu0 %v1618_v57, %s1719_s2 }
 0x683   :  { %v1620_v59 = vpop.eup %1619 }
 0x684   :  { %v432_v60 = vadd.f32 1.0, %v1620_v59 }
 0x686   :  { %1621 = vrcp.f32 %v432_v60 }
 0x690   :  { %v1622_v61 = vpop.eup %1621 }
 0x691   :  { %v439_v3 = vmul.f32 %v1622_v61, %v437_v2 }
 0x6f4   :  { %v442_v62 = vpop.permute.xlu0 %441 }
 0x6f5   :  { %v444_v63 = vmul.f32 %v1622_v61, %v442_v62 }
 0x6f7   :  { %446 = vrot.lane.b32.xlu1 %v444_v63, %s1720_s3 }
 0x769   :  { %v447_v4 = vpop.permute.xlu1 %446 }
 0x76a   :  { %v449_v6 = vadd.f32 %v447_v4, %v439_v3 }
 0x76c   :  { %1623 = vtanh.f32 %v449_v6  ;;  %v544_v26 = vrot.slane %v449_v6, 6 }
 0x776   :  { %v1624_v7 = vpop.eup %1623 }
 0x777   :  { %452 = vrot.lane.b32.xlu0 %v1624_v7, %s1719_s2 }
 0x7e9   :  { %v453_v8 = vpop.permute.xlu0 %452 }
 0x7ea   :  { %v1869_v9 = vmul.f32 %v1622_v61, %v453_v8 }
 0x7ec   :  { %v457_v11 = vrot.slane %v1869_v9, 4  ;;  %v1131_v9 = vld [vmem:[%s2037_s6 + $0x40] sm:$0xff] }
 0x7ee   :  { %458 = vrot.lane.b32.xlu1 %v457_v11, %s1720_s3 }
 0x860   :  { %v459_v12 = vpop.permute.xlu1 %458 }
 0x861   :  { %1396 = vmatmul.mubr.msk.f32.vlgmr.msra.gmra.mrb[4].mxu0 %vm144_vm3, %v459_v12 }
 0x862   :  { %1509 = vmatpush3.bf16.msra.mxu0 %v1792_v5  ;;  %1417 = vmatprep.mubr.msk.f32.mxu0 %vm1717_vm0, %v1718_v1 }
 0x863   :  { %1510 = vmatprep.subr.bf16.mxu0 %v1716_v0 }
 0x866   :  { %1512 = vmatpush3.bf16.msra.mxu0 %v1807_v10 }
 0x867   :  { %1519 = vmatprep.subr.bf16.mxu0 %v1716_v0 }
 0x934   :  { %v528_v14 = vpop.f32.mrb[4].mxu0 }
 0x935   :  { %v533_v16 = vrot.slane %v528_v14, 2  ;;  %v1397_v17 = vpop.f32.mrb[5].mxu0 }
 0x937   :  { %v535_v18 = vadd.f32 %v533_v16, %v1831_v15 }
 0x939   :  { %1625 = vtanh.f32 %v535_v18  ;;  %v1243_v20 = vmul.f32 -1.442695, %v535_v18 }
 0x93b   :  { %1627 = vpow2.f32 %v1243_v20 }
 0x943   :  { %v1626_v19 = vpop.eup %1625 }
 0x944   :  { %548 = vrot.lane.b32.xlu0 %v1626_v19, %s1719_s2 }
 0x945   :  { %v1628_v21 = vpop.eup %1627 }
 0x946   :  { %v539_v22 = vadd.f32 1.0, %v1628_v21 }
 0x948   :  { %1629 = vrcp.f32 %v539_v22 }
 0x952   :  { %v1630_v23 = vpop.eup %1629 }
 0x953   :  { %v546_v27 = vmul.f32 %v1630_v23, %v544_v26 }
 0x9b6   :  { %v549_v24 = vpop.permute.xlu0 %548 }
 0x9b7   :  { %v551_v25 = vmul.f32 %v1630_v23, %v549_v24 }
 0x9b9   :  { %553 = vrot.lane.b32.xlu1 %v551_v25, %s1720_s3 }
 0xa2b   :  { %v554_v28 = vpop.permute.xlu1 %553 }
 0xa2c   :  { %v556_v29 = vadd.f32 %v554_v28, %v546_v27 }
 0xa2e   :  { %1631 = vtanh.f32 %v556_v29  ;;  %v648_v45 = vrot.slane %v556_v29, 6 }
 0xa38   :  { %v1632_v15 = vpop.eup %1631 }
 0xa39   :  { %559 = vrot.lane.b32.xlu0 %v1632_v15, %s1719_s2 }
 0xaab   :  { %v560_v30 = vpop.permute.xlu0 %559 }
 0xaac   :  { %v1886_v31 = vmul.f32 %v1630_v23, %v560_v30 }
 0xaae   :  { %v564_v33 = vrot.slane %v1886_v31, 6  ;;  %v1138_v31 = vld [vmem:[%s2037_s6 + $0x78] sm:$0xff] }
 0xab0   :  { %565 = vrot.lane.b32.xlu1 %v564_v33, %s1720_s3 }
 0xb22   :  { %v566_v34 = vpop.permute.xlu1 %565 }
 0xb23   :  { %1407 = vmatmul.mubr.msk.f32.vlgmr.msra.gmra.mrb[4].mxu1 %vm144_vm3, %v566_v34 }
 0xb24   :  { %1515 = vmatpush3.bf16.msra.mxu1 %v1792_v5  ;;  %1428 = vmatprep.mubr.msk.f32.mxu1 %vm1717_vm0, %v1718_v1 }
 0xb25   :  { %1516 = vmatprep.subr.bf16.mxu1 %v1716_v0 }
 0xb28   :  { %1518 = vmatpush3.bf16.msra.mxu1 %v1807_v10 }
 0xbf6   :  { %v635_v35 = vpop.f32.mrb[4].mxu1 }
 0xbf7   :  { %v639_v36 = vadd.f32 %v635_v35, %v1829_v13  ;;  %v1408_v37 = vpop.f32.mrb[5].mxu1 }
 0xbf9   :  { %1633 = vtanh.f32 %v639_v36  ;;  %v1245_v39 = vmul.f32 -1.442695, %v639_v36 }
 0xbfb   :  { %1635 = vpow2.f32 %v1245_v39 }
 0xc03   :  { %v1634_v38 = vpop.eup %1633 }
 0xc04   :  { %652 = vrot.lane.b32.xlu0 %v1634_v38, %s1719_s2 }
 0xc05   :  { %v1636_v40 = vpop.eup %1635 }
 0xc06   :  { %v643_v41 = vadd.f32 1.0, %v1636_v40 }
 0xc08   :  { %1637 = vrcp.f32 %v643_v41 }
 0xc12   :  { %v1638_v42 = vpop.eup %1637 }
 0xc13   :  { %v650_v46 = vmul.f32 %v1638_v42, %v648_v45 }
 0xc76   :  { %v653_v43 = vpop.permute.xlu0 %652 }
 0xc77   :  { %v655_v44 = vmul.f32 %v1638_v42, %v653_v43 }
 0xc79   :  { %657 = vrot.lane.b32.xlu1 %v655_v44, %s1720_s3 }
 0xceb   :  { %v658_v47 = vpop.permute.xlu1 %657 }
 0xcec   :  { %v660_v48 = vadd.f32 %v658_v47, %v650_v46 }
 0xcee   :  { %1639 = vtanh.f32 %v660_v48 }
 0xcf8   :  { %v1640_v49 = vpop.eup %1639 }
 0xcf9   :  { %663 = vrot.lane.b32.xlu0 %v1640_v49, %s1719_s2 }
 0xd6b   :  { %v664_v52 = vpop.permute.xlu0 %663 }
 0xd6c   :  { %v666_v53 = vmul.f32 %v1638_v42, %v664_v52  ;;  %v1030_v52 = vld [vmem:[#allocation2 + $0x88] sm:$0xff] }
 0xd6e   :  { %668 = vrot.lane.b32.xlu1 %v666_v53, %s1720_s3  ;;  %v1013_v53 = vld [vmem:[#allocation2] sm:$0xff] }
 0xde0   :  { %v1903_v54 = vpop.permute.xlu1 %668 }
 0xde1   :  { %1418 = vmatmul.mubr.msk.f32.vlgmr.msra.gmra.mrb[6].mxu0 %vm144_vm3, %v1903_v54 }
 0xde2   :  { %1521 = vmatpush3.bf16.msra.mxu0 %v1792_v5  ;;  %1439 = vmatprep.mubr.msk.f32.mxu0 %vm1717_vm0, %v1718_v1 }
 0xde3   :  { %1522 = vmatprep.subr.bf16.mxu0 %v1716_v0 }
 0xde6   :  { %1524 = vmatpush3.bf16.msra.mxu0 %v1807_v10  ;;  %v754_v10 = vrot.slane %v660_v48, 6 }
 0xde7   :  { %1557 = vmatprep.subr.bf16.mxu0 %v1716_v0 }
 0xeb4   :  { %v738_v55 = vpop.f32.mrb[6].mxu0 }
 0xeb5   :  { %v743_v56 = vrot.slane %v738_v55, 6  ;;  %v1419_v57 = vpop.f32.mrb[7].mxu0 }
 0xeb6   :  { %v1031_v57 = vld [vmem:[#allocation2 + $0x90] sm:$0xff] }
 0xeb7   :  { %v745_v58 = vadd.f32 %v743_v56, %v1829_v13  ;;  %v1014_v56 = vld [vmem:[#allocation2 + $0x8] sm:$0xff] }
 0xeb9   :  { %1641 = vtanh.f32 %v745_v58  ;;  %v1247_v60 = vmul.f32 -1.442695, %v745_v58  ;;  %v1032_v58 = vld [vmem:[#allocation2 + $0x98] sm:$0xff] }
 0xebb   :  { %1643 = vpow2.f32 %v1247_v60  ;;  %v1529_v60 = vpack.c.bf16 %v1032_v58, %v1031_v57  ;;  %v1127_v57 = vld [vmem:[%s2037_s6 + $0x20] sm:$0xff]  ;;  %v1128_v58 = vld [vmem:[%s2037_s6 + $0x28] sm:$0xff] }
 0xec3   :  { %v1642_v59 = vpop.eup %1641 }
 0xec4   :  { %758 = vrot.lane.b32.xlu0 %v1642_v59, %s1719_s2  ;;  %v1527_v59 = vpack.c.bf16 %v1014_v56, %v1013_v53  ;;  %v1126_v53 = vld [vmem:[%s2037_s6 + $0x18] sm:$0xff] }
 0xec5   :  { %v1644_v5 = vpop.eup %1643 }
 0xec6   :  { %v749_v61 = vadd.f32 1.0, %v1644_v5  ;;  %v1015_v5 = vld [vmem:[#allocation2 + $0x10] sm:$0xff] }
 0xec8   :  { %1645 = vrcp.f32 %v749_v61  ;;  %v1016_v61 = vld [vmem:[#allocation2 + $0x18] sm:$0xff] }
 0xed2   :  { %v1646_v62 = vpop.eup %1645 }
 0xed3   :  { %v756_v3 = vmul.f32 %v1646_v62, %v754_v10  ;;  %v1018_v10 = vld [vmem:[#allocation2 + $0x28] sm:$0xff] }
 0xf36   :  { %v759_v63 = vpop.permute.xlu0 %758 }
 0xf37   :  { %v761_v2 = vmul.f32 %v1646_v62, %v759_v63  ;;  %v1034_v63 = vld [vmem:[#allocation2 + $0xa8] sm:$0xff] }
 0xf39   :  { %763 = vrot.lane.b32.xlu1 %v761_v2, %s1720_s3  ;;  %v1531_v2 = vpack.c.bf16 %v1016_v61, %v1015_v5  ;;  %v1129_v5 = vld [vmem:[%s2037_s6 + $0x30] sm:$0xff]  ;;  %v1130_v61 = vld [vmem:[%s2037_s6 + $0x38] sm:$0xff] }
 0xfab   :  { %v764_v4 = vpop.permute.xlu1 %763 }
 0xfac   :  { %v766_v6 = vadd.f32 %v764_v4, %v756_v3  ;;  %v1035_v3 = vld [vmem:[#allocation2 + $0xb0] sm:$0xff]  ;;  %v1036_v4 = vld [vmem:[#allocation2 + $0xb8] sm:$0xff] }
 0xfae   :  { %1647 = vtanh.f32 %v766_v6  ;;  %v861_v28 = vrot.slane %v766_v6, 6 }
 0xfb8   :  { %v1648_v7 = vpop.eup %1647 }
 0xfb9   :  { %769 = vrot.lane.b32.xlu0 %v1648_v7, %s1719_s2  ;;  %v1537_v7 = vpack.c.bf16 %v1036_v4, %v1035_v3 }
0x102b   :  { %v770_v8 = vpop.permute.xlu0 %769 }
0x102c   :  { %v772_v12 = vmul.f32 %v1646_v62, %v770_v8  ;;  %v1033_v62 = vld [vmem:[#allocation2 + $0xa0] sm:$0xff]  ;;  %v1019_v8 = vld [vmem:[#allocation2 + $0x30] sm:$0xff] }
0x102d   :  { %v1533_v50 = vpack.c.bf16 %v1034_v63, %v1033_v62  ;;  %v1567_v62 = vpack.c.bf16 %v1130_v61, %v1129_v5  ;;  %v1134_v63 = vld [vmem:[%s2037_s6 + $0x58] sm:$0xff] }
0x102e   :  { %v774_v14 = vrot.slane %v772_v12, 2  ;;  %v1020_v12 = vld [vmem:[#allocation2 + $0x38] sm:$0xff] }
0x1030   :  { %775 = vrot.lane.b32.xlu1 %v774_v14, %s1720_s3 }
0x10a2   :  { %v776_v16 = vpop.permute.xlu1 %775 }
0x10a3   :  { %1429 = vmatmul.mubr.msk.f32.vlgmr.msra.gmra.mrb[6].mxu1 %vm144_vm3, %v776_v16  ;;  %v1038_v16 = vld [vmem:[#allocation2 + $0xc8] sm:$0xff] }
0x1176   :  { %v845_v17 = vpop.f32.mrb[6].mxu1 }
0x1177   :  { %v850_v18 = vrot.slane %v845_v17, 4  ;;  %v1430_v19 = vpop.f32.mrb[7].mxu1  ;;  %v1539_v17 = vpack.c.bf16 %v1020_v12, %v1019_v8 }
0x1178   :  { %v1021_v19 = vld [vmem:[#allocation2 + $0x40] sm:$0xff] }
0x1179   :  { %v852_v20 = vadd.f32 %v850_v18, %v1829_v13 }
0x117b   :  { %1649 = vtanh.f32 %v852_v20  ;;  %v1249_v22 = vmul.f32 -1.442695, %v852_v20  ;;  %v1022_v20 = vld [vmem:[#allocation2 + $0x48] sm:$0xff] }
0x117d   :  { %1651 = vpow2.f32 %v1249_v22  ;;  %v1040_v22 = vld [vmem:[#allocation2 + $0xd8] sm:$0xff] }
0x1185   :  { %v1650_v21 = vpop.eup %1649 }
0x1186   :  { %865 = vrot.lane.b32.xlu0 %v1650_v21, %s1719_s2  ;;  %v1039_v21 = vld [vmem:[#allocation2 + $0xd0] sm:$0xff] }
0x1187   :  { %v1652_v23 = vpop.eup %1651 }
0x1188   :  { %v856_v24 = vadd.f32 1.0, %v1652_v23  ;;  %v1543_v23 = vpack.c.bf16 %v1022_v20, %v1021_v19 }
0x118a   :  { %1653 = vrcp.f32 %v856_v24  ;;  %v1545_v24 = vpack.c.bf16 %v1040_v22, %v1039_v21 }
0x1194   :  { %v1654_v25 = vpop.eup %1653 }
0x1195   :  { %v863_v29 = vmul.f32 %v1654_v25, %v861_v28 }
0x11f8   :  { %v866_v26 = vpop.permute.xlu0 %865 }
0x11f9   :  { %v868_v27 = vmul.f32 %v1654_v25, %v866_v26  ;;  %v1024_v26 = vld [vmem:[#allocation2 + $0x58] sm:$0xff] }
0x11fb   :  { %870 = vrot.lane.b32.xlu1 %v868_v27, %s1720_s3 }
0x126d   :  { %v871_v15 = vpop.permute.xlu1 %870 }
0x126e   :  { %v1922_v30 = vadd.f32 %v871_v15, %v863_v29  ;;  %v1041_v15 = vld [vmem:[#allocation2 + $0xe0] sm:$0xff] }
0x1270   :  { %1655 = vtanh.f32 %v1922_v30  ;;  %v968_v28 = vrot.slane %v1922_v30, 6  ;;  %v1123_v30 = vld [vmem:[%s2037_s6] sm:$0xff] }
0x127a   :  { %v1656_v34 = vpop.eup %1655 }
0x127b   :  { %876 = vrot.lane.b32.xlu0 %v1656_v34, %s1719_s2  ;;  %v1042_v34 = vld [vmem:[#allocation2 + $0xe8] sm:$0xff] }
0x12ed   :  { %v877_v35 = vpop.permute.xlu0 %876 }
0x12ee   :  { %v1926_v36 = vmul.f32 %v1654_v25, %v877_v35  ;;  %v1023_v25 = vld [vmem:[#allocation2 + $0x50] sm:$0xff] }
0x12ef   :  { %v1547_v27 = vpack.c.bf16 %v1024_v26, %v1023_v25 }
0x12f0   :  { %v881_v37 = vrot.slane %v1926_v36, 4 }
0x12f2   :  { %882 = vrot.lane.b32.xlu1 %v881_v37, %s1720_s3 }
0x1364   :  { %v883_v38 = vpop.permute.xlu1 %882 }
0x1365   :  { %1440 = vmatmul.mubr.msk.f32.vlgmr.msra.gmra.mrb[8].mxu0 %vm144_vm3, %v883_v38  ;;  %v1549_v38 = vpack.c.bf16 %v1042_v34, %v1041_v15 }
0x1366   :  { %1474 = vmatprep.mubr.msk.f32.mxu0 %vm1717_vm0, %v1718_v1  ;;  %v1591_v1 = vpack.i.bf16 %v350_v51, %v774_v14  ;;  %v1017_v51 = vld [vmem:[#allocation2 + $0x20] sm:$0xff] }
0x1367   :  { %v1535_v6 = vpack.c.bf16 %v1018_v10, %v1017_v51  ;;  %v1037_v14 = vld [vmem:[#allocation2 + $0xc0] sm:$0xff] }
0x1368   :  { %v1541_v18 = vpack.c.bf16 %v1038_v16, %v1037_v14 }
0x1438   :  { %v952_v39 = vpop.f32.mrb[8].mxu0 }
0x1439   :  { %v957_v40 = vrot.slane %v952_v39, 2  ;;  %v1441_v41 = vpop.f32.mrb[9].mxu0  ;;  %v1025_v39 = vld [vmem:[#allocation2 + $0x60] sm:$0xff] }
0x143b   :  { %v959_v42 = vadd.f32 %v957_v40, %v1829_v13  ;;  %v1029_v13 = vld [vmem:[#allocation2 + $0x80] sm:$0xff]  ;;  %v1026_v40 = vld [vmem:[#allocation2 + $0x68] sm:$0xff] }
0x143c   :  { %v1525_v55 = vpack.c.bf16 %v1030_v52, %v1029_v13  ;;  %v1125_v13 = vld [vmem:[%s2037_s6 + $0x10] sm:$0xff] }
0x143d   :  { %1657 = vtanh.f32 %v959_v42  ;;  %v1251_v44 = vmul.f32 -1.442695, %v959_v42  ;;  %v1551_v42 = vpack.c.bf16 %v1026_v40, %v1025_v39  ;;  %v1561_v56 = vpack.c.bf16 %v1126_v53, %v1125_v13 }
0x143e   :  { %1526 = vmatprep.subr.bf16.mxu1 %v1525_v55 }
0x143f   :  { %1659 = vpow2.f32 %v1251_v44  ;;  %1528 = vmatpush3.bf16.msra.mxu1 %v1527_v59  ;;  %v1044_v44 = vld [vmem:[#allocation2 + $0xf8] sm:$0xff]  ;;  %v1596_v59 = vpack.i.bf16 %v457_v11, %v881_v37  ;;  %v1132_v11 = vld [vmem:[%s2037_s6 + $0x48] sm:$0xff]  ;;  %v1133_v37 = vld [vmem:[%s2037_s6 + $0x50] sm:$0xff] }
0x1440   :  { %1530 = vmatprep.subr.bf16.mxu1 %v1529_v60  ;;  %v1564_v60 = vpack.c.bf16 %v1128_v58, %v1127_v57  ;;  %v1570_v36 = vpack.c.bf16 %v1132_v11, %v1131_v9 }
0x1443   :  { %1532 = vmatpush3.bf16.msra.mxu1 %v1531_v2  ;;  %v1573_v2 = vpack.c.bf16 %v1134_v63, %v1133_v37 }
0x1444   :  { %1534 = vmatprep.subr.bf16.mxu1 %v1533_v50 }
0x1447   :  { %v1658_v43 = vpop.eup %1657  ;;  %1536 = vmatpush3.bf16.msra.mxu1 %v1535_v6 }
0x1448   :  { %972 = vrot.lane.b32.xlu0 %v1658_v43, %s1719_s2  ;;  %1538 = vmatprep.subr.bf16.mxu1 %v1537_v7  ;;  %v1043_v43 = vld [vmem:[#allocation2 + $0xf0] sm:$0xff] }
0x1449   :  { %v1660_v45 = vpop.eup %1659 }
0x144a   :  { %v963_v46 = vadd.f32 1.0, %v1660_v45  ;;  %v1553_v45 = vpack.c.bf16 %v1044_v44, %v1043_v43 }
0x144b   :  { %1540 = vmatpush3.bf16.msra.mxu1 %v1539_v17 }
0x144c   :  { %1661 = vrcp.f32 %v963_v46  ;;  %1542 = vmatprep.subr.bf16.mxu1 %v1541_v18  ;;  %v1027_v46 = vld [vmem:[#allocation2 + $0x70] sm:$0xff] }
0x144f   :  { %1544 = vmatpush3.bf16.msra.mxu1 %v1543_v23  ;;  %v1252_v23 = vld [vmem:[%s2036_s5] ss:$0 sm:$0xff] }
0x1450   :  { %1546 = vmatprep.subr.bf16.mxu1 %v1545_v24 }
0x1453   :  { %1548 = vmatpush3.bf16.msra.mxu1 %v1547_v27 }
0x1454   :  { %1550 = vmatprep.subr.bf16.mxu1 %v1549_v38 }
0x1456   :  { %v1937_v47 = vpop.eup %1661 }
0x1457   :  { %v970_v29 = vmul.f32 %v1937_v47, %v968_v28  ;;  %1552 = vmatpush3.bf16.msra.mxu1 %v1551_v42 }
0x1458   :  { %1554 = vmatprep.subr.bf16.mxu1 %v1553_v45 }
0x14ba   :  { %v973_v48 = vpop.permute.xlu0 %972 }
0x14bb   :  { %v975_v49 = vmul.f32 %v1937_v47, %v973_v48  ;;  %v1028_v48 = vld [vmem:[#allocation2 + $0x78] sm:$0xff] }
0x14bd   :  { %977 = vrot.lane.b32.xlu1 %v975_v49, %s1720_s3  ;;  %v1555_v49 = vpack.c.bf16 %v1028_v48, %v1027_v46 }
0x14bf   :  { %1556 = vmatpush3.bf16.msra.mxu1 %v1555_v49 }
0x14c1   :  { %1592 = vrot.lane.b32.xlu1 %v1591_v1, %s1719_s2  ;;  %v1124_v1 = vld [vmem:[%s2037_s6 + $0x8] sm:$0xff] }
0x14c2   :  { %v1558_v52 = vpack.c.bf16 %v1124_v1, %v1123_v30 }
0x14c4   :  { %1559 = vmatpush3.bf16.msra.mxu0 %v1558_v52 }
0x14c5   :  { %1560 = vmatprep.subr.bf16.mxu0 %v1716_v0 }
0x14c8   :  { %1562 = vmatpush3.bf16.msra.mxu0 %v1561_v56 }
0x14c9   :  { %1563 = vmatprep.subr.bf16.mxu0 %v1716_v0 }
0x14cc   :  { %1565 = vmatpush3.bf16.msra.mxu0 %v1564_v60 }
0x14cd   :  { %1566 = vmatprep.subr.bf16.mxu0 %v1716_v0 }
0x14d0   :  { %1568 = vmatpush3.bf16.msra.mxu0 %v1567_v62 }
0x14d1   :  { %1569 = vmatprep.subr.bf16.mxu0 %v1716_v0 }
0x14d4   :  { %1571 = vmatpush3.bf16.msra.mxu0 %v1570_v36 }
0x14d5   :  { %1572 = vmatprep.subr.bf16.mxu0 %v1716_v0 }
0x14d8   :  { %1574 = vmatpush3.bf16.msra.mxu0 %v1573_v2 }
0x14d9   :  { %1575 = vmatprep.subr.bf16.mxu0 %v1716_v0 }
0x152f   :  { %v978_v35 = vpop.permute.xlu1 %977 }
0x1530   :  { %v980_v41 = vadd.f32 %v978_v35, %v970_v29 }
0x1532   :  { %1663 = vtanh.f32 %v980_v41 }
0x1533   :  { %v1593_v50 = vpop.permute.xlu1 %1592 }
0x1534   :  { %v1595_v10 = vunpack.i.h.bf16 %v1593_v50  ;;  %v1594_v3 = vunpack.i.l.bf16 %v1593_v50 }
0x1536   :  { %v1005_v12 = vsel %vm144_vm3, %v1838_v32, %v1595_v10  ;;  %v1010_v14 = vsel %vm144_vm3, %v1903_v54, %v1594_v3  ;;  %v1136_v32 = vld [vmem:[%s2037_s6 + $0x68] sm:$0xff]  ;;  %v1137_v54 = vld [vmem:[%s2037_s6 + $0x70] sm:$0xff] }
0x153c   :  { %v1664_v55 = vpop.eup %1663 }
0x153d   :  { %983 = vrot.lane.b32.xlu0 %v1664_v55, %s1719_s2 }
0x1541   :  { %1597 = vrot.lane.b32.xlu0 %v1596_v59, %s1721_s22 }
0x15af   :  { %v984_v51 = vpop.permute.xlu0 %983 }
0x15b0   :  { %v986_v4 = vmul.f32 %v1937_v47, %v984_v51  ;;  %v1135_v47 = vld [vmem:[%s2037_s6 + $0x60] sm:$0xff]  ;;  %s1687_s6 = scalar_lea.vmem %s1225_s21, 32 }
0x15b1   :  { %v1576_v21 = vpack.c.bf16 %v1136_v32, %v1135_v47  ;;  %p1688_p8 = scmp.ne.s32.totalorder %s1225_s21, %s1687_s6  ;;  %p1693_p10 = scmp.lt.s32.totalorder %s1687_s6, %s1687_s6 }
0x15b2   :  { %v1003_v16 = vrot.slane %v986_v4, 6 }
0x15b3   :  { %v1598_v6 = vpop.permute.xlu0 %1597  ;;  %1577 = vmatpush3.bf16.msra.mxu0 %v1576_v21  ;;  %p1694_p11 = por %p1693_p10, %p1692_p9 }
0x15b4   :  { %v1600_v7 = vunpack.i.h.bf16 %v1598_v6  ;;  %v1599_v8 = vunpack.i.l.bf16 %v1598_v6  ;;  %1578 = vmatprep.subr.bf16.mxu0 %v1716_v0  ;;  %v1253_v0 = vld [vmem:[%s2038_s7] ss:$0 sm:$0xff] }
0x15b5   :  { %p1695_p12 = pnand %p1694_p11, %p1688_p8 }
0x15b6   :  { %v1007_v17 = vsel %vm1006_vm4, %v1005_v12, %v1600_v7  ;;  %v1011_v18 = vsel %vm1006_vm4, %v1010_v14, %v1599_v8 }
0x15b7   :  { %v1012_v19 = vsel %vm1008_vm5, %v1011_v18, %v1003_v16  ;;  %v1009_v20 = vsel %vm1008_vm5, %v1007_v17, %v564_v33  ;;  %v1579_v33 = vpack.c.bf16 %v1138_v31, %v1137_v54 }
0x15b8   :  { %1116 = vmatprep.mubr.f32.mxu1 %v1012_v19 }
0x15b9   :  { %1117 = vmatmul.mubr.f32.vlgmr.msra.gmra.mrb[8].mxu1 %v1009_v20  ;;  %1580 = vmatpush3.bf16.msra.mxu0 %v1579_v33 }
0x168c   :  { %v1329_v22 = vpop.f32.mrb[8].mxu1 }
0x168d   :  { %v1330_v24 = vpop.f32.mrb[9].mxu1 }
0x168e   :  { %v1331_v25 = vadd.f32 %v1330_v24, %v1329_v22 }
0x1690   :  { %v1119_v26 = vadd.f32 %v1331_v25, %v1252_v23 }
0x1692   :  { %v1122_v27 = vmax.f32 %v1119_v26, 0.0 }
0x1694   :  { %1475 = vmatmul.mubr.f32.vlgmr.msra.gmra.mrb[10].mxu0 %v1122_v27 }
0x1767   :  { %v1212_v28 = vpop.f32.mrb[10].mxu0 }
0x1768   :  { %v1213_v29 = vadd.f32 %v1253_v0, %v1212_v28  ;;  %v1476_v15 = vpop.f32.mrb[11].mxu0 }
0x176a   :  { %1217 = vst.msk [vmem:[#allocation5] sm:$0x3] %vm1216_vm6, %v1213_v29 }
0x176b   :  { %1698 = shalt.err (!%p1695_p12)
}
0x176c   :  { %s1699_s4 = scalar_lea.hbm %s2039_s8, 32 }
0x176d   :  { %p1700_p13 = scmp.ne.s32.totalorder %s2039_s8, %s1699_s4  ;;  %p1703_p0 = scmp.lt.u32.totalorder %s1699_s4, %s2039_s8 }
0x176f   :  { %p1705_p1 = pnand %p1703_p0, %p1700_p13 }
0x1771   :  { %1708 = shalt.err (!%p1705_p1)
}
0x1772   :  { %1227 = dma.vmem_to_hbm [thread:$0]  %s1225_s21, 32, %s2039_s8, [#allocation4]  }
0x1773   :  { %1711 = dma.done.wait [#allocation4], 32  }
0x1774   :  { %1712 = vsyncadd [#allocation4], 4294967264 }
0x1775   :  { %1231 = vsyncpa [#allocation3], 1 }
0x1776   :  { %1232 = vsyncpa [#allocation4], 1 }

</bundles_post_ra>
